<compile_context>
chip_gen: v5e
topology: v5e:2x2
jax: 0.10.0
libtpu: 0.0.40
codegen_flags: <defaults>
</compile_context>

<pallas_src>
import jax
import jax.numpy as jnp
from jax.experimental import pallas as pl
from jax.experimental.pallas import tpu as pltpu


# --------------------------------------------------------------------------- #
# Kernel
# --------------------------------------------------------------------------- #
def _ffn_kernel(x_ref, w1_ref, b1_ref, w2_ref, b2_ref, o_ref):
    """One (TM, d_model) row tile.  Grid axis 1 iterates d_ff chunks
    (reduction); the fp32 output tile doubles as the accumulator."""
    f = pl.program_id(1)

    @pl.when(f == 0)
    def _():
        o_ref[...] = jnp.zeros_like(o_ref)

    # linear1 chunk: (TM, D)bf16 @ (D, TF)bf16 -> fp32; bias + ReLU fused.
    xb = x_ref[...].astype(jnp.bfloat16)
    h = jnp.dot(xb, w1_ref[...], preferred_element_type=jnp.float32)
    h = jnp.maximum(h + b1_ref[...], 0.0)

    # linear2 contribution of this d_ff chunk, accumulated into the resident
    # fp32 output tile (block index constant across f).
    o_ref[...] += jnp.dot(h.astype(w2_ref.dtype), w2_ref[...],
                          preferred_element_type=jnp.float32)

    @pl.when(f == pl.num_programs(1) - 1)
    def _():
        o_ref[...] = o_ref[...] + b2_ref[...]


# --------------------------------------------------------------------------- #
# Tile / VMEM derivation
# --------------------------------------------------------------------------- #
def _aligned_divisor(dim, cap, aligns):
    """Largest tile t <= cap that divides `dim` and is a multiple of the first
    alignment in `aligns` that divides `dim`.  Falls back to the full dim
    (always a legal block shape) if no aligned divisor exists."""
    for a in aligns:
        if dim % a == 0:
            t = min(cap, dim)
            t -= t % a
            while t >= a and dim % t != 0:
                t -= a
            if t >= a:
                return t
    return dim


def _derive_tiles_and_vmem(M, d_model, d_ff):
    """Pick TM (row tile) / TF (d_ff tile) against the real VMEM budget of the
    current TPU generation and return (TM, TF, vmem_limit_bytes)."""
    try:
        vmem_cap = int(pltpu.get_tpu_info().vmem_capacity_bytes)
    except Exception:
        vmem_cap = 64 * 1024 * 1024          # conservative (v7x-class)

    small_vmem = vmem_cap <= 64 * 1024 * 1024
    # v7x: MXU-bound already at TM~320 but only 64 MiB VMEM -> modest TM, TF<=256.
    # v5e/v6e: 128 MiB VMEM; v6e roofline wants a larger row tile (~512+).
    tm_caps = (384, 256, 128) if small_vmem else (512, 384, 256, 128)
    tf_caps = (256, 128) if small_vmem else (512, 256, 128)
    budget = int(0.6 * vmem_cap)

    def cost(tm, tf):
        return (2 * tm * d_model * 4         # x tile (fp32, double-buffered)
                + 2 * d_model * tf * 2       # W1^T chunk (bf16, double-buffered)
                + 2 * tf * d_model * 2       # W2^T chunk (bf16, double-buffered)
                + 2 * tm * d_model * 4       # out/acc tile (fp32, double-buffered)
                + 2 * (tf + d_model) * 4)    # biases

    tm = tf = None
    for tfc in tf_caps:
        tf_c = _aligned_divisor(d_ff, tfc, (128,))
        for tmc in tm_caps:
            tm_c = _aligned_divisor(M, tmc, (128, 16, 8))
            if cost(tm_c, tf_c) <= budget:
                tm, tf = tm_c, tf_c
                break
        if tm is not None:
            break
    if tm is None:
        # Last resort: smallest aligned tiles (full-dim fallbacks may still be
        # larger than the budget for pathological shapes; compile will say so).
        tm = _aligned_divisor(M, 8, (8,))
        tf = _aligned_divisor(d_ff, 128, (128,))

    # v7x-class chips have 2 TensorCores: make sure the "parallel" row axis has
    # at least 2 tiles so the grid can shard across both cores.
    if small_vmem and M // tm < 2 and M % 2 == 0 and (M // 2) % 8 == 0:
        tm = M // 2

    vmem_limit = min(int(0.9 * vmem_cap),
                     max(cost(tm, tf) + (4 << 20), 32 << 20))
    return tm, tf, vmem_limit


# --------------------------------------------------------------------------- #
# Parameter prep (init-time) + forward wrapper
# --------------------------------------------------------------------------- #
def prepare_ffn_params(w1, b1, w2, b2):
    """One-time parameter preparation (hoisted out of the per-call path):
       PyTorch nn.Linear layout w1: (d_ff, d_model), w2: (d_model, d_ff) is
       transposed to (in, out) and cast to bf16 for the MXU; biases stay fp32."""
    d_ff, d_model = w1.shape
    assert w2.shape == (d_model, d_ff)
    return {
        "w1t": jnp.asarray(w1).T.astype(jnp.bfloat16),           # (d_model, d_ff)
        "b1":  jnp.asarray(b1, jnp.float32).reshape(1, d_ff),
        "w2t": jnp.asarray(w2).T.astype(jnp.bfloat16),           # (d_ff, d_model)
        "b2":  jnp.asarray(b2, jnp.float32).reshape(1, d_model),
    }


@jax.jit
def feed_forward(x, params):
    """x: (..., d_model) fp32 -> (..., d_model) fp32, matching the PyTorch
    module's forward (bf16 matmul operands, fp32 accumulation -- intentional)."""
    w1t, b1 = params["w1t"], params["b1"]
    w2t, b2 = params["w2t"], params["b2"]
    d_model, d_ff = w1t.shape

    orig_shape = x.shape
    assert orig_shape[-1] == d_model
    M = 1
    for s in orig_shape[:-1]:
        M *= s
    x2 = jnp.asarray(x, jnp.float32).reshape(M, d_model)

    TM, TF, vmem_limit = _derive_tiles_and_vmem(M, d_model, d_ff)
    grid = (M // TM, d_ff // TF)

    out = pl.pallas_call(
        _ffn_kernel,
        out_shape=jax.ShapeDtypeStruct((M, d_model), jnp.float32),
        grid_spec=pltpu.PrefetchScalarGridSpec(
            num_scalar_prefetch=0,
            grid=grid,
            in_specs=[
                pl.BlockSpec((TM, d_model), lambda i, f: (i, 0)),   # x rows (fp32)
                pl.BlockSpec((d_model, TF), lambda i, f: (0, f)),   # W1^T chunk
                pl.BlockSpec((1, TF),       lambda i, f: (0, f)),   # b1 chunk
                pl.BlockSpec((TF, d_model), lambda i, f: (f, 0)),   # W2^T chunk
                pl.BlockSpec((1, d_model),  lambda i, f: (0, 0)),   # b2
            ],
            out_specs=pl.BlockSpec((TM, d_model), lambda i, f: (i, 0)),
        ),
        compiler_params=pltpu.CompilerParams(
            dimension_semantics=("parallel", "arbitrary"),
            vmem_limit_bytes=vmem_limit),
    )(x2, w1t, b1, w2t, b2)

    return out.reshape(orig_shape)


def _reference(x, w1, b1, w2, b2):
    """Pure-JAX fp32 reference mirroring the PyTorch forward."""
    h = jnp.maximum(x @ w1.T + b1, 0.0)
    return h @ w2.T + b2


# --------------------------------------------------------------------------- #
# Demo / correctness check
# --------------------------------------------------------------------------- #
if __name__ == "__main__":
    B, S, d_model, d_ff = 2, 8, 32, 64

    key = jax.random.PRNGKey(0)
    kx, k1, k2, k3, k4 = jax.random.split(key, 5)
    x = jax.random.normal(kx, (B, S, d_model), jnp.float32)
    w1 = jax.random.normal(k1, (d_ff, d_model), jnp.float32) * 0.05
    b1 = jax.random.normal(k2, (d_ff,), jnp.float32) * 0.05
    w2 = jax.random.normal(k3, (d_model, d_ff), jnp.float32) * 0.05
    b2 = jax.random.normal(k4, (d_model,), jnp.float32) * 0.05

    params = prepare_ffn_params(w1, b1, w2, b2)   # init-time, not per-call
    out = jax.block_until_ready(feed_forward(x, params))
    ref = _reference(x, w1, b1, w2, b2)

    assert out.shape == x.shape
    # bf16 matmul operands vs fp32 reference -> loosened tolerance (intentional).
    assert jnp.allclose(out, ref, atol=2e-2, rtol=2e-2), "mismatch vs reference"

    print("KERNEL_OK")
</pallas_src>

<mosaic_0001>
module attributes {stable_mosaic.version = 11 : i64} {
  func.func @_ffn_kernel(%arg0: i32, %arg1: i32, %arg2: memref<8x32xf32, #tpu.memory_space<vmem>>, %arg3: memref<32x64xbf16, #tpu.memory_space<vmem>>, %arg4: memref<1x64xf32, #tpu.memory_space<vmem>>, %arg5: memref<64x32xbf16, #tpu.memory_space<vmem>>, %arg6: memref<1x32xf32, #tpu.memory_space<vmem>>, %arg7: memref<8x32xf32, #tpu.memory_space<vmem>>) attributes {dimension_semantics = [#tpu.dimension_semantics<parallel>, #tpu.dimension_semantics<arbitrary>], iteration_bounds = array<i64: 2, 1>, scalar_prefetch = 0 : i64, scratch_operands = 0 : i64, tpu.core_type = #tpu.core_type<tc>, window_params = [{transform_indices = @transform_0, window_bounds = array<i64: 8, 32>}, {transform_indices = @transform_1, window_bounds = array<i64: 32, 64>}, {transform_indices = @transform_2, window_bounds = array<i64: 1, 64>}, {transform_indices = @transform_3, window_bounds = array<i64: 64, 32>}, {pipeline_mode = #tpu.pipeline_mode<synchronous>, transform_indices = @transform_4, window_bounds = array<i64: 1, 32>}, {transform_indices = @transform_5, window_bounds = array<i64: 8, 32>}]} {
    %c0_i32 = arith.constant 0 : i32
    %0 = arith.cmpi eq, %arg1, %c0_i32 : i32
    %1 = arith.extui %0 : i1 to i32
    %c0_i32_0 = arith.constant 0 : i32
    %2 = arith.cmpi ne, %1, %c0_i32_0 : i32
    scf.if %2 {
      %cst_16 = arith.constant 0.000000e+00 : f32
      %21 = vector.broadcast %cst_16 : f32 to vector<8x32xf32>
      %c0_17 = arith.constant 0 : index
      %c0_18 = arith.constant 0 : index
      %22 = vector.load %arg7[%c0_17, %c0_18] : memref<8x32xf32, #tpu.memory_space<vmem>>, vector<8x32xf32>
      tpu.vector_store %arg7[%c0_17, %c0_18], %21 {strides = array<i32>} : memref<8x32xf32, #tpu.memory_space<vmem>>, vector<8x32xf32>,
    } else {
    }
    %c0 = arith.constant 0 : index
    %c0_1 = arith.constant 0 : index
    %3 = vector.load %arg2[%c0, %c0_1] : memref<8x32xf32, #tpu.memory_space<vmem>>, vector<8x32xf32>
    %4 = arith.truncf %3 : vector<8x32xf32> to vector<8x32xbf16>
    %c0_2 = arith.constant 0 : index
    %c0_3 = arith.constant 0 : index
    %5 = vector.load %arg3[%c0_2, %c0_3] : memref<32x64xbf16, #tpu.memory_space<vmem>>, vector<32x64xbf16>
    %cst = arith.constant dense<0.000000e+00> : vector<8x64xf32>
    %6 = tpu.matmul %4, %5, %cst {dimension_numbers = #tpu.dot_dimension_numbers<[1], [0], [0], [1], [0, 0, 1, 1], [], []>} : vector<8x32xbf16>, vector<32x64xbf16>, vector<8x64xf32> -> vector<8x64xf32>
    %c0_4 = arith.constant 0 : index
    %c0_5 = arith.constant 0 : index
    %7 = vector.load %arg4[%c0_4, %c0_5] : memref<1x64xf32, #tpu.memory_space<vmem>>, vector<1x64xf32>
    %8 = vector.broadcast %7 : vector<1x64xf32> to vector<8x64xf32>
    %9 = arith.addf %6, %8 : vector<8x64xf32>
    %cst_6 = arith.constant 0.000000e+00 : f32
    %10 = vector.broadcast %cst_6 : f32 to vector<8x64xf32>
    %11 = arith.maximumf %9, %10 : vector<8x64xf32>
    %c0_7 = arith.constant 0 : index
    %c0_8 = arith.constant 0 : index
    %12 = vector.load %arg7[%c0_7, %c0_8] : memref<8x32xf32, #tpu.memory_space<vmem>>, vector<8x32xf32>
    %13 = arith.truncf %11 : vector<8x64xf32> to vector<8x64xbf16>
    %c0_9 = arith.constant 0 : index
    %c0_10 = arith.constant 0 : index
    %14 = vector.load %arg5[%c0_9, %c0_10] : memref<64x32xbf16, #tpu.memory_space<vmem>>, vector<64x32xbf16>
    %cst_11 = arith.constant dense<0.000000e+00> : vector<8x32xf32>
    %15 = tpu.matmul %13, %14, %cst_11 {dimension_numbers = #tpu.dot_dimension_numbers<[1], [0], [0], [1], [0, 0, 1, 1], [], []>} : vector<8x64xbf16>, vector<64x32xbf16>, vector<8x32xf32> -> vector<8x32xf32>
    %16 = arith.addf %12, %15 : vector<8x32xf32>
    %c0_12 = arith.constant 0 : index
    %c0_13 = arith.constant 0 : index
    %17 = vector.load %arg7[%c0_12, %c0_13] : memref<8x32xf32, #tpu.memory_space<vmem>>, vector<8x32xf32>
    tpu.vector_store %arg7[%c0_12, %c0_13], %16 {strides = array<i32>} : memref<8x32xf32, #tpu.memory_space<vmem>>, vector<8x32xf32>,
    %c0_i32_14 = arith.constant 0 : i32
    %18 = arith.cmpi eq, %arg1, %c0_i32_14 : i32
    %19 = arith.extui %18 : i1 to i32
    %c0_i32_15 = arith.constant 0 : i32
    %20 = arith.cmpi ne, %19, %c0_i32_15 : i32
    scf.if %20 {
      %c0_16 = arith.constant 0 : index
      %c0_17 = arith.constant 0 : index
      %21 = vector.load %arg7[%c0_16, %c0_17] : memref<8x32xf32, #tpu.memory_space<vmem>>, vector<8x32xf32>
      %c0_18 = arith.constant 0 : index
      %c0_19 = arith.constant 0 : index
      %22 = vector.load %arg6[%c0_18, %c0_19] : memref<1x32xf32, #tpu.memory_space<vmem>>, vector<1x32xf32>
      %23 = vector.broadcast %22 : vector<1x32xf32> to vector<8x32xf32>
      %24 = arith.addf %21, %23 : vector<8x32xf32>
      %c0_20 = arith.constant 0 : index
      %c0_21 = arith.constant 0 : index
      %25 = vector.load %arg7[%c0_20, %c0_21] : memref<8x32xf32, #tpu.memory_space<vmem>>, vector<8x32xf32>
      tpu.vector_store %arg7[%c0_20, %c0_21], %24 {strides = array<i32>} : memref<8x32xf32, #tpu.memory_space<vmem>>, vector<8x32xf32>,
    } else {
    }
    return
  }
  func.func @transform_0(%arg0: i32, %arg1: i32) -> (i32, i32) {
    %c0_i32 = arith.constant 0 : i32
    %c0_i32_0 = arith.constant 0 : i32
    return %arg0, %c0_i32 : i32, i32
  }
  func.func @transform_1(%arg0: i32, %arg1: i32) -> (i32, i32) {
    %c0_i32 = arith.constant 0 : i32
    %c0_i32_0 = arith.constant 0 : i32
    return %c0_i32, %arg1 : i32, i32
  }
  func.func @transform_2(%arg0: i32, %arg1: i32) -> (i32, i32) {
    %c0_i32 = arith.constant 0 : i32
    %c0_i32_0 = arith.constant 0 : i32
    return %c0_i32, %arg1 : i32, i32
  }
  func.func @transform_3(%arg0: i32, %arg1: i32) -> (i32, i32) {
    %c0_i32 = arith.constant 0 : i32
    %c0_i32_0 = arith.constant 0 : i32
    return %arg1, %c0_i32 : i32, i32
  }
  func.func @transform_4(%arg0: i32, %arg1: i32) -> (i32, i32) {
    %c0_i32 = arith.constant 0 : i32
    %c0_i32_0 = arith.constant 0 : i32
    %c0_i32_1 = arith.constant 0 : i32
    return %c0_i32, %c0_i32_0 : i32, i32
  }
  func.func @transform_5(%arg0: i32, %arg1: i32) -> (i32, i32) {
    %c0_i32 = arith.constant 0 : i32
    %c0_i32_0 = arith.constant 0 : i32
    return %arg0, %c0_i32 : i32, i32
  }
}

</mosaic_0001>

<bundles_post_ra>
// kernel: feed_forward.1
= control target key start
LH: loop header
LB: loop body
LE: loop exit
PB: predicated region body
PF: predicated region fallthrough
CT: control target
= control target key end

     0   :  { %10 = vsyncpa [#allocation3], 0  ;;  %s864_s0 = inlined_call_operand.vmem [shape: f32[16,32], index: 0, kind: input, shape index: {}]   ;;  %s865_s1 = inlined_call_operand.vmem [shape: bf16[32,64], index: 1, kind: input, shape index: {}]   ;;  %s866_s2 = inlined_call_operand.vmem [shape: f32[1,64], index: 2, kind: input, shape index: {}]   ;;  %s867_s3 = inlined_call_operand.vmem [shape: bf16[64,32], index: 3, kind: input, shape index: {}]   ;;  %s868_s4 = inlined_call_operand.vmem [shape: f32[1,32], index: 4, kind: input, shape index: {}]   ;;  %s869_s5 = inlined_call_operand.hbm [shape: f32[16,32], index: 5, kind: output, shape index: {}]  }
   0x1   :  { %12 = vsyncpa [#allocation3 + $0x1], 0  ;;  %s735_s18 = smov 0   ;;  %s737_s19 = smov 0  }
   0x2   :  { %s739_s20 = smov 0   ;;  %s741_s21 = smov 0  }
   0x3   :  { %s743_s22 = smov 0   ;;  %s745_s23 = smov 0  }
   0x4 LB: > { %s520_s24 = sadd.s32 4294967295, %s702_s23   ;;  %s521_s25 = sadd.s32 4294967294, %s702_s23   ;;  %s702_s23 = sphi %s745_s23, %s18_s23   ;;  %s698_s22 = sphi %s743_s22, %s876_s22   ;;  %s694_s21 = sphi %s741_s21, %s875_s21   ;;  %s690_s20 = sphi %s739_s20, %s874_s20   ;;  %s686_s19 = sphi %s737_s19, %s873_s19   ;;  %s682_s18 = sphi %s735_s18, %s872_s18  }
   0x5   : > { %s30_s26 = sadd.s32 1, %s698_s22  ;;  %s162_s27 = sadd.s32 1, %s690_s20 }
   0x6   : > { %p32_p0 = scmp.ge.s32.totalorder %s30_s26, 2  ;;  %p172_p1 = scmp.ne.s32.totalorder %s690_s20, %s686_s19 }
   0x7   : > { %p173_p2 = scmp.eq.s32.totalorder %s520_s24, 1  ;;  %p178_p3 = scmp.ne.s32.totalorder %s686_s19, %s682_s18 }
   0x8   : > { %s878_s26 = smov (%p32_p0, %s30_s26), 0  ;;  %p179_p5 = scmp.eq.s32.totalorder %s521_s25, 1 }
   0x9   : > { %p775_p4 = por %p173_p2, %p172_p1  ;;  %s159_s29 = ssub.s32 %s698_s22, %s878_s26 }
   0xa   : > { %p527_p6 = scmp.ge.s32.totalorder %s702_s23, 1  ;;  %p160_p7 = scmp.eq.s32.totalorder %s159_s29, 0 }
   0xb   : > { %p782_p8 = por %p179_p5, %p178_p3  ;;  %p229_p9 = scmp.lt.s32.totalorder %s702_s23, 3 }
   0xc   : > { %s788_s6 = scalar_select %p160_p7, %s690_s20, %s162_s27  }
   0xd   : > { %p230_p10 = pnand %p527_p6, %p229_p9 }
   0xe   : > { %p268_p11 = scmp.lt.s32.totalorder (!%p230_p10), %s694_s21, 1  ;;  %s265_s7 = sand.u32 (!%p230_p10), 1, %s686_s19  }
   0xf   : > { %233 = sbr.rel (%p230_p10) target bundleno = 301 (0x12d), region = 40  ;;  %s528_s10 = sshll.u32 (!%p230_p10), %s265_s7, 3 }
  0x10   : > { %s267_s11 = scalar_lea.vmem (!%p230_p10), [#allocation2], %s528_s10  ;;  %s557_s14 = sshll.u32 (!%p230_p10), %s694_s21, 3 }
  0x11   : > { %s406_s17 = scalar_lea.hbm (!%p230_p10), %s869_s5, %s557_s14  ;;  %s408_s27 = sshll.u32 (!%p230_p10), %s267_s11, 4  ;;  %s409_s27 = int_to_ptr.vmem [resolvable:$true] %s408_s27 }
  0x12   : > { %s410_s29 = sshll.u32 (!%p230_p10), %s406_s17, 4  ;;  %s411_s29 = int_to_ptr.hbm [resolvable:$true] %s410_s29 }
  0x13   : > { %s638_s8 = sshra.s32 (!%p230_p10), %s411_s29, 4  ;;  %s639_s8 = int_to_ptr.hbm [resolvable:$true] %s638_s8 }
  0x14   : > { %v561_v0 = vld [vmem:[%s865_s1 + $0x8] sm:$0xff]  ;;  %v565_v1 = vld [vmem:[%s867_s3 + $0x18] sm:$0xff]  ;;  %v560_v2 = vld [vmem:[%s865_s1] sm:$0xff]  ;;  %s269_s13 = scalar_select %p268_p11, %s694_s21, 1  ;;  %vm290_vm0 = vcmask 261120   ;;  %v704_v8 = vmov 0.0  }
  0x15   : > { %324 = vmatpush.bf16.msra.mxu0 %v561_v0  ;;  %374 = vmatpush.bf16.msra.mxu1 %v565_v1  ;;  %v564_v3 = vld [vmem:[%s867_s3 + $0x10] sm:$0xff]  ;;  %v563_v6 = vld [vmem:[%s867_s3 + $0x8] sm:$0xff]  ;;  %v562_v7 = vld [vmem:[%s867_s3] sm:$0xff]  ;;  %291 = vst.msk [vmem:[%s267_s11] sm:$0xff] %vm290_vm0, %v704_v8  ;;  %vm366_vm1 = vcmask 523264   ;;  %s396_s21 = scalar_lea.sflag [#allocation3], %s265_s7  ;;  %p645_p1 = scmp.lt.s32.totalorder %s639_s8, %s869_s5 }
  0x16   : > { %s529_s16 = sshll.u32 %s269_s13, 3  ;;  %v622_v9 = vld [vmem:[%s866_s2] ss:$0 sm:$0xff]  ;;  %s640_s9 = scalar_lea.hbm %s639_s8, 8 }
  0x17   : > { %s271_s25 = scalar_lea.vmem %s864_s0, %s529_s16  ;;  %v623_v18 = vld [vmem:[%s868_s4] ss:$0 sm:$0xff]  ;;  %p641_p12 = scmp.ne.s32.totalorder %s639_s8, %s640_s9 }
  0x18   : > { %v292_v4 = vld [vmem:[%s271_s25] sm:$0xff]  ;;  %s644_s13 = scalar_lea.hbm %s869_s5, 16 }
  0x19   : > { %325 = vmatpush.bf16.msra.mxu0 %v560_v2  ;;  %375 = vmatpush.bf16.msra.mxu1 %v564_v3  ;;  %v293_v5 = vpack.c.bf16 %v292_v4, %v292_v4  ;;  %p642_p13 = pnand %p641_p12, %p775_p4  ;;  %p646_p2 = scmp.lt.s32.totalorder %s644_s13, %s640_s9 }
  0x1b   : > { %p643_p0 = pneg %p642_p13  ;;  %p647_p3 = por %p646_p2, %p645_p1 }
  0x1c   : > { %538 = vmatmul.msk.bf16.vlgmr.msra.gmra.mxu0 %vm290_vm0, %v293_v5  ;;  %v332_v15 = vld [vmem:[%s267_s11] sm:$0xff] }
  0x1d   : > { %376 = vmatpush.bf16.msra.mxu1 %v563_v6  ;;  %p648_p5 = pnand %p647_p3, %p643_p0 }
  0x21   : > { %377 = vmatpush.bf16.msra.mxu1 %v562_v7 }
  0x99   : > { %v327_v10 = vpop.f32.mrf.mxu0 }
  0x9a   : > { %v328_v11 = vadd.f32 %v622_v9, %v327_v10 }
  0x9c   : > { %v331_v12 = vmax.f32 %v328_v11, 0.0 }
  0x9e   : > { %v333_v13 = vpack.c.bf16 %v331_v12, %v331_v12 }
  0xa0   : > { %555 = vmatmul.msk.bf16.vlgmr.msra.gmra.mxu1 %vm366_vm1, %v333_v13 }
  0xa1   : > { %v329_v14 = vpop.f32.mrf.mxu0 }
 0x11d   : > { %v379_v16 = vpop.f32.mrf.mxu1 }
 0x11e   : > { %v383_v17 = vadd.f32 %v379_v16, %v332_v15 }
 0x120   : > { %384 = vst.msk [vmem:[%s267_s11] sm:$0xff] %vm290_vm0, %v383_v17 }
 0x125   : > { %v381_v19 = vpop.f32.mrf.mxu1 }
 0x127   : > { %v388_v20 = vld [vmem:[%s267_s11] sm:$0xff] }
 0x128   : > { %v393_v21 = vadd.f32 %v623_v18, %v388_v20 }
 0x12a   : > { %394 = vst.msk [vmem:[%s267_s11] sm:$0xff] %vm290_vm0, %v393_v21 }
 0x12b   : > { %651 = shalt.err (!%p648_p5)
}
 0x12c   : > { %566 = dma.vmem_to_hbm [thread:$0]  (%p775_p4), %s409_s27, 128, %s411_s29, %s396_s21  }
 0x12d PF: > { %p572_p6 = scmp.ge.s32.totalorder %s702_s23, 2  ;;  %s422_s7 = sand.u32 1, %s682_s18  }
 0x12e   : > { %s423_s11 = scalar_lea.sflag [#allocation3], %s422_s7 }
 0x12f   : > { %p569_p7 = pnand %p572_p6, %p782_p8 }
 0x131   : > { %p570_p9 = pneg %p569_p7 }
 0x133   : > { %677 = dma.done.wait (%p570_p9), %s423_s11, 128  }
 0x134   : > { %679 = vsyncadd (%p570_p9), %s423_s11, 4294967168  ;;  %s18_s23 = sadd.s32 1, %s702_s23   ;;  %s872_s18 = smov %s686_s19 }
 0x135   : > { %p15_p10 = scmp.ge.s32.totalorder %s18_s23, 4   ;;  %s873_s19 = smov %s690_s20 }
 0x136   : > { %s874_s20 = smov %s788_s6  ;;  %s875_s21 = smov %s698_s22 }
 0x137   : > { %s876_s22 = smov %s878_s26  ;;  %17 = sbr.rel (!%p15_p10) target bundleno = 4 (0x4), region = 92 }
 0x13c   :  { %429 = vsyncpa [#allocation3], 1 }
 0x13d   :  { %431 = vsyncpa [#allocation3 + $0x1], 1 }

</bundles_post_ra>
